<compile_context>
chip_gen: v6e
topology: v6e:2x2x1
jax: 0.10.0
libtpu: 0.0.40
codegen_flags: <defaults>
</compile_context>

<pallas_src>
import functools

import jax
import jax.numpy as jnp
from jax.experimental import pallas as pl
from jax.experimental.pallas import tpu as pltpu


VAR_EPS = 1e-4
BN_EPS = 1e-3  # nn.BatchNorm1d(..., eps=0.001)
LANE = 128
SUBLANE = 8


def _round_up(n, m):
    return ((n + m - 1) // m) * m


def _encoder_kernel(x_ref, cov_ref, eps_ref, w1x_ref, w1c_ref, b1_ref,
                    wh_ref, bh_ref, out_ref, *, n_output, var_eps):
    L = n_output

    # ---- layer 0: Linear (+ folded eval-mode BatchNorm + bias) -> ReLU ----
    # Split matmul (x @ w1x + cov @ w1c) avoids materializing concat([x, cov]) in HBM.
    h = jnp.dot(x_ref[...], w1x_ref[...], preferred_element_type=jnp.float32)
    h = h + jnp.dot(cov_ref[...], w1c_ref[...], preferred_element_type=jnp.float32)
    h = jnp.maximum(h + b1_ref[...], 0.0)
    h = h.astype(wh_ref.dtype)  # keep MXU operands in the chosen operand dtype

    # ---- fused mean/var heads: single MXU pass; live cols [0:L]=mean, [L:2L]=log-var ----
    heads = jnp.dot(h, wh_ref[...], preferred_element_type=jnp.float32) + bh_ref[...]

    q_m = heads[:, 0:L]
    q_v = jnp.exp(heads[:, L:2 * L]) + var_eps        # exp/sqrt on live lanes only
    z = q_m + jnp.sqrt(q_v) * eps_ref[...]            # reparameterized sample

    # ---- single jointly-padded lane-dense output slab: [ q_m | q_v | z | 0-pad ] ----
    out_ref[...] = jnp.zeros_like(out_ref)            # deterministic pad lanes (VMEM-only cost)
    out_ref[:, 0:L] = q_m
    out_ref[:, L:2 * L] = q_v
    out_ref[:, 2 * L:3 * L] = z


def encoder_forward(x, cov, params, key, *, batch_tile=1024, var_eps=VAR_EPS,
                    operand_dtype=jnp.float32, vmem_limit_bytes=48 * 1024 * 1024):
    """Encoder forward. x: (B, n_input), cov: (B, n_cat). Returns (q_m, q_v, z).

    operand_dtype=jnp.bfloat16 halves the activation/weight DMA streams and uses the
    bf16 MXU path on v6e/v7x (outputs stay f32); default f32 keeps exact parity.
    """
    B, n_input = x.shape
    n_cat = cov.shape[1]
    n_hidden = params["w1"].shape[1]
    n_output = params["wm"].shape[1]

    # ---- fold BatchNorm (eval running stats) + layer-0 bias into w1/b1, once ----
    scale = params["gamma"] * jax.lax.rsqrt(params["rvar"] + BN_EPS)        # (1, H)
    w1f = params["w1"] * scale                                              # (Kin, H)
    b1f = (params["b1"] - params["rmean"]) * scale + params["beta"]         # (1, H)

    h_pad = _round_up(n_hidden, LANE)
    head_w = _round_up(2 * n_output, LANE)   # fused mean/var head width (joint pad)
    out_w = _round_up(3 * n_output, LANE)    # packed [q_m|q_v|z] output width (joint pad)

    # pad hidden axis (zero cols -> relu(0)=0 -> no contribution downstream)
    w1f = jnp.pad(w1f, ((0, 0), (0, h_pad - n_hidden)))
    b1f = jnp.pad(b1f, ((0, 0), (0, h_pad - n_hidden)))

    # fused + jointly-padded heads: (h_pad, head_w), live cols 0:2*n_output
    wm = jnp.pad(params["wm"], ((0, h_pad - n_hidden), (0, 0)))
    wv = jnp.pad(params["wv"], ((0, h_pad - n_hidden), (0, 0)))
    w_heads = jnp.pad(jnp.concatenate([wm, wv], axis=1),
                      ((0, 0), (0, head_w - 2 * n_output)))
    b_heads = jnp.pad(jnp.concatenate([params["bm"], params["bv"]], axis=1),
                      ((0, 0), (0, head_w - 2 * n_output)))

    # split layer-0 weight so x / cov are consumed separately (no activation concat)
    w1x = w1f[:n_input].astype(operand_dtype)
    w1c = w1f[n_input:].astype(operand_dtype)
    w_heads = w_heads.astype(operand_dtype)
    x_in = x.astype(operand_dtype)
    cov_in = cov.astype(operand_dtype)

    # reparameterization noise, host-generated (portable: no TPU-only PRNG primitive)
    eps = jax.random.normal(key, (B, n_output), jnp.float32)

    # ---- batch tile selection: large tiles, >=2 grid steps, VMEM-budgeted ----
    obytes = jnp.dtype(operand_dtype).itemsize
    weight_bytes = (w1x.size + w1c.size + w_heads.size) * obytes + (b1f.size + b_heads.size) * 4
    row_bytes = (n_input + n_cat) * obytes + n_output * 4 + out_w * 4
    budget = max(vmem_limit_bytes - weight_bytes - (4 << 20), 1 << 20)

    tb = min(batch_tile, _round_up(B, SUBLANE))
    tb = max(SUBLANE, (tb // SUBLANE) * SUBLANE)
    if B > SUBLANE:  # keep >= 2 grid steps so megacore ("parallel") sharding engages
        tb = min(tb, max(SUBLANE, _round_up((B + 1) // 2, SUBLANE)))
    tb = min(tb, max(SUBLANE, (budget // (2 * row_bytes)) // SUBLANE * SUBLANE))

    b_pad = _round_up(B, tb)
    if b_pad != B:
        pad = b_pad - B
        x_in = jnp.pad(x_in, ((0, pad), (0, 0)))
        cov_in = jnp.pad(cov_in, ((0, pad), (0, 0)))
        eps = jnp.pad(eps, ((0, pad), (0, 0)))

    out = pl.pallas_call(
        functools.partial(_encoder_kernel, n_output=n_output, var_eps=var_eps),
        out_shape=jax.ShapeDtypeStruct((b_pad, out_w), jnp.float32),
        grid_spec=pltpu.PrefetchScalarGridSpec(
            num_scalar_prefetch=0,
            grid=(b_pad // tb,),
            in_specs=[
                # activations / noise: tiled over batch
                pl.BlockSpec((tb, n_input), lambda i: (i, 0)),
                pl.BlockSpec((tb, n_cat), lambda i: (i, 0)),
                pl.BlockSpec((tb, n_output), lambda i: (i, 0)),
                # parameters: constant index_maps -> loaded once, VMEM-resident
                pl.BlockSpec((n_input, h_pad), lambda i: (0, 0)),
                pl.BlockSpec((n_cat, h_pad), lambda i: (0, 0)),
                pl.BlockSpec((1, h_pad), lambda i: (0, 0)),
                pl.BlockSpec((h_pad, head_w), lambda i: (0, 0)),
                pl.BlockSpec((1, head_w), lambda i: (0, 0)),
            ],
            out_specs=pl.BlockSpec((tb, out_w), lambda i: (i, 0)),
        ),
        compiler_params=pltpu.CompilerParams(
            dimension_semantics=("parallel",),
            vmem_limit_bytes=vmem_limit_bytes,
        ),
    )(x_in, cov_in, eps, w1x, w1c, b1f, w_heads, b_heads)

    q_m = out[:B, 0:n_output]
    q_v = out[:B, n_output:2 * n_output]
    z = out[:B, 2 * n_output:3 * n_output]
    return q_m, q_v, z


def init_params(key, n_input, n_output, n_cat, n_hidden):
    """Deterministic synthetic parameter init (kaiming-ish for weights)."""
    ks = jax.random.split(key, 8)
    n_in_eff = n_input + n_cat

    def kaiming(k, fan_in, fan_out):
        bound = jnp.sqrt(6.0 / fan_in)
        return jax.random.uniform(k, (fan_in, fan_out), jnp.float32, -bound, bound)

    return {
        # FCLayers layer 0 (weights stored pre-transposed as (in, out))
        "w1": kaiming(ks[0], n_in_eff, n_hidden),
        "b1": jnp.zeros((1, n_hidden), jnp.float32),
        # BatchNorm1d(n_hidden) — eval mode running stats + affine params
        "gamma": 1.0 + 0.1 * jax.random.normal(ks[1], (1, n_hidden), jnp.float32),
        "beta": 0.1 * jax.random.normal(ks[2], (1, n_hidden), jnp.float32),
        "rmean": 0.1 * jax.random.normal(ks[3], (1, n_hidden), jnp.float32),
        "rvar": jnp.abs(1.0 + 0.1 * jax.random.normal(ks[4], (1, n_hidden), jnp.float32)),
        # mean / var heads
        "wm": kaiming(ks[5], n_hidden, n_output),
        "bm": jnp.zeros((1, n_output), jnp.float32),
        "wv": kaiming(ks[6], n_hidden, n_output),
        "bv": jnp.zeros((1, n_output), jnp.float32),
    }


def _reference(x, cov, p):
    """Pure-JAX reference of the deterministic part (un-folded BN, un-fused heads)."""
    xc = jnp.concatenate([x, cov], axis=-1)
    h = xc @ p["w1"] + p["b1"]
    h = (h - p["rmean"]) * jax.lax.rsqrt(p["rvar"] + BN_EPS) * p["gamma"] + p["beta"]
    h = jnp.maximum(h, 0.0)
    q_m = h @ p["wm"] + p["bm"]
    q_v = jnp.exp(h @ p["wv"] + p["bv"]) + VAR_EPS
    return q_m, q_v


if __name__ == "__main__":
    # Small shapes consistent with the module's forward. With B=256 the tile
    # selection clamps tb to 128 -> a 2-step "parallel" grid (megacore friendly).
    B, n_input, n_cat, n_hidden, n_output = 256, 48, 8, 32, 16

    key = jax.random.PRNGKey(0)
    k_x, k_cov, k_params, k_eps = jax.random.split(key, 4)

    x = jax.random.normal(k_x, (B, n_input), jnp.float32)
    cov = jax.random.normal(k_cov, (B, n_cat), jnp.float32)
    params = init_params(k_params, n_input, n_output, n_cat, n_hidden)

    q_m, q_v, latent = encoder_forward(x, cov, params, k_eps)
    jax.block_until_ready((q_m, q_v, latent))

    # Deterministic outputs must match the pure-JAX reference (BN folding and head
    # fusion are algebraically exact; only fp-rounding-level differences remain).
    rm, rv = _reference(x, cov, params)
    assert jnp.allclose(q_m, rm, atol=1e-4, rtol=1e-4)
    assert jnp.allclose(q_v, rv, atol=1e-4, rtol=1e-4)

    # Stochastic output: z = q_m + sqrt(q_v) * eps with eps drawn from the same key.
    eps_ref = jax.random.normal(k_eps, (B, n_output), jnp.float32)
    assert jnp.allclose(latent, q_m + jnp.sqrt(q_v) * eps_ref, atol=1e-4, rtol=1e-4)
    assert bool(jnp.all(jnp.isfinite(latent)))

    print("KERNEL_OK")
</pallas_src>

<mosaic_0001>
module attributes {stable_mosaic.version = 11 : i64} {
  func.func @_encoder_kernel(%arg0: i32, %arg1: memref<128x48xf32, #tpu.memory_space<vmem>>, %arg2: memref<128x8xf32, #tpu.memory_space<vmem>>, %arg3: memref<128x16xf32, #tpu.memory_space<vmem>>, %arg4: memref<48x128xf32, #tpu.memory_space<vmem>>, %arg5: memref<8x128xf32, #tpu.memory_space<vmem>>, %arg6: memref<1x128xf32, #tpu.memory_space<vmem>>, %arg7: memref<128x128xf32, #tpu.memory_space<vmem>>, %arg8: memref<1x128xf32, #tpu.memory_space<vmem>>, %arg9: memref<128x128xf32, #tpu.memory_space<vmem>>) attributes {dimension_semantics = [#tpu.dimension_semantics<parallel>], iteration_bounds = array<i64: 2>, scalar_prefetch = 0 : i64, scratch_operands = 0 : i64, tpu.core_type = #tpu.core_type<tc>, window_params = [{transform_indices = @transform_0, window_bounds = array<i64: 128, 48>}, {transform_indices = @transform_1, window_bounds = array<i64: 128, 8>}, {transform_indices = @transform_2, window_bounds = array<i64: 128, 16>}, {pipeline_mode = #tpu.pipeline_mode<synchronous>, transform_indices = @transform_3, window_bounds = array<i64: 48, 128>}, {pipeline_mode = #tpu.pipeline_mode<synchronous>, transform_indices = @transform_4, window_bounds = array<i64: 8, 128>}, {pipeline_mode = #tpu.pipeline_mode<synchronous>, transform_indices = @transform_5, window_bounds = array<i64: 1, 128>}, {pipeline_mode = #tpu.pipeline_mode<synchronous>, transform_indices = @transform_6, window_bounds = array<i64: 128, 128>}, {pipeline_mode = #tpu.pipeline_mode<synchronous>, transform_indices = @transform_7, window_bounds = array<i64: 1, 128>}, {transform_indices = @transform_8, window_bounds = array<i64: 128, 128>}]} {
    %c0 = arith.constant 0 : index
    %c0_0 = arith.constant 0 : index
    %0 = vector.load %arg1[%c0, %c0_0] : memref<128x48xf32, #tpu.memory_space<vmem>>, vector<128x48xf32>
    %c0_1 = arith.constant 0 : index
    %c0_2 = arith.constant 0 : index
    %1 = vector.load %arg4[%c0_1, %c0_2] : memref<48x128xf32, #tpu.memory_space<vmem>>, vector<48x128xf32>
    %cst = arith.constant dense<0.000000e+00> : vector<128x128xf32>
    %2 = tpu.matmul %0, %1, %cst {dimension_numbers = #tpu.dot_dimension_numbers<[1], [0], [0], [1], [0, 0, 1, 1], [], []>} : vector<128x48xf32>, vector<48x128xf32>, vector<128x128xf32> -> vector<128x128xf32>
    %c0_3 = arith.constant 0 : index
    %c0_4 = arith.constant 0 : index
    %3 = vector.load %arg2[%c0_3, %c0_4] : memref<128x8xf32, #tpu.memory_space<vmem>>, vector<128x8xf32>
    %c0_5 = arith.constant 0 : index
    %c0_6 = arith.constant 0 : index
    %4 = vector.load %arg5[%c0_5, %c0_6] : memref<8x128xf32, #tpu.memory_space<vmem>>, vector<8x128xf32>
    %cst_7 = arith.constant dense<0.000000e+00> : vector<128x128xf32>
    %5 = tpu.matmul %3, %4, %cst_7 {dimension_numbers = #tpu.dot_dimension_numbers<[1], [0], [0], [1], [0, 0, 1, 1], [], []>} : vector<128x8xf32>, vector<8x128xf32>, vector<128x128xf32> -> vector<128x128xf32>
    %6 = arith.addf %2, %5 : vector<128x128xf32>
    %c0_8 = arith.constant 0 : index
    %c0_9 = arith.constant 0 : index
    %7 = vector.load %arg6[%c0_8, %c0_9] : memref<1x128xf32, #tpu.memory_space<vmem>>, vector<1x128xf32>
    %8 = vector.broadcast %7 : vector<1x128xf32> to vector<128x128xf32>
    %9 = arith.addf %6, %8 : vector<128x128xf32>
    %cst_10 = arith.constant 0.000000e+00 : f32
    %10 = vector.broadcast %cst_10 : f32 to vector<128x128xf32>
    %11 = arith.maximumf %9, %10 : vector<128x128xf32>
    %c0_11 = arith.constant 0 : index
    %c0_12 = arith.constant 0 : index
    %12 = vector.load %arg7[%c0_11, %c0_12] : memref<128x128xf32, #tpu.memory_space<vmem>>, vector<128x128xf32>
    %cst_13 = arith.constant dense<0.000000e+00> : vector<128x128xf32>
    %13 = tpu.matmul %11, %12, %cst_13 {dimension_numbers = #tpu.dot_dimension_numbers<[1], [0], [0], [1], [0, 0, 1, 1], [], []>} : vector<128x128xf32>, vector<128x128xf32>, vector<128x128xf32> -> vector<128x128xf32>
    %c0_14 = arith.constant 0 : index
    %c0_15 = arith.constant 0 : index
    %14 = vector.load %arg8[%c0_14, %c0_15] : memref<1x128xf32, #tpu.memory_space<vmem>>, vector<1x128xf32>
    %15 = vector.broadcast %14 : vector<1x128xf32> to vector<128x128xf32>
    %16 = arith.addf %13, %15 : vector<128x128xf32>
    %17 = vector.extract_strided_slice %16 {offsets = [0, 0], sizes = [128, 16], strides = [1, 1]} : vector<128x128xf32> to vector<128x16xf32>
    %18 = vector.extract_strided_slice %16 {offsets = [0, 16], sizes = [128, 16], strides = [1, 1]} : vector<128x128xf32> to vector<128x16xf32>
    %19 = math.exp %18 : vector<128x16xf32>
    %cst_16 = arith.constant 9.99999974E-5 : f32
    %20 = vector.broadcast %cst_16 : f32 to vector<128x16xf32>
    %21 = arith.addf %19, %20 : vector<128x16xf32>
    %22 = math.sqrt %21 : vector<128x16xf32>
    %c0_17 = arith.constant 0 : index
    %c0_18 = arith.constant 0 : index
    %23 = vector.load %arg3[%c0_17, %c0_18] : memref<128x16xf32, #tpu.memory_space<vmem>>, vector<128x16xf32>
    %24 = arith.mulf %22, %23 : vector<128x16xf32>
    %25 = arith.addf %17, %24 : vector<128x16xf32>
    %cst_19 = arith.constant 0.000000e+00 : f32
    %26 = vector.broadcast %cst_19 : f32 to vector<128x128xf32>
    %c0_20 = arith.constant 0 : index
    %c0_21 = arith.constant 0 : index
    %27 = vector.load %arg9[%c0_20, %c0_21] : memref<128x128xf32, #tpu.memory_space<vmem>>, vector<128x128xf32>
    tpu.vector_store %arg9[%c0_20, %c0_21], %26 {strides = array<i32>} : memref<128x128xf32, #tpu.memory_space<vmem>>, vector<128x128xf32>,
    %c0_22 = arith.constant 0 : index
    %c0_23 = arith.constant 0 : index
    %28 = vector.load %arg9[%c0_22, %c0_23] : memref<128x128xf32, #tpu.memory_space<vmem>>, vector<128x16xf32>
    tpu.vector_store %arg9[%c0_22, %c0_23], %17 {strides = array<i32>} : memref<128x128xf32, #tpu.memory_space<vmem>>, vector<128x16xf32>,
    %c0_24 = arith.constant 0 : index
    %c16 = arith.constant 16 : index
    %29 = vector.load %arg9[%c0_24, %c16] : memref<128x128xf32, #tpu.memory_space<vmem>>, vector<128x16xf32>
    tpu.vector_store %arg9[%c0_24, %c16], %21 {strides = array<i32>} : memref<128x128xf32, #tpu.memory_space<vmem>>, vector<128x16xf32>,
    %c0_25 = arith.constant 0 : index
    %c32 = arith.constant 32 : index
    %30 = vector.load %arg9[%c0_25, %c32] : memref<128x128xf32, #tpu.memory_space<vmem>>, vector<128x16xf32>
    tpu.vector_store %arg9[%c0_25, %c32], %25 {strides = array<i32>} : memref<128x128xf32, #tpu.memory_space<vmem>>, vector<128x16xf32>,
    return
  }
  func.func @transform_0(%arg0: i32) -> (i32, i32) {
    %c0_i32 = arith.constant 0 : i32
    %c0_i32_0 = arith.constant 0 : i32
    return %arg0, %c0_i32 : i32, i32
  }
  func.func @transform_1(%arg0: i32) -> (i32, i32) {
    %c0_i32 = arith.constant 0 : i32
    %c0_i32_0 = arith.constant 0 : i32
    return %arg0, %c0_i32 : i32, i32
  }
  func.func @transform_2(%arg0: i32) -> (i32, i32) {
    %c0_i32 = arith.constant 0 : i32
    %c0_i32_0 = arith.constant 0 : i32
    return %arg0, %c0_i32 : i32, i32
  }
  func.func @transform_3(%arg0: i32) -> (i32, i32) {
    %c0_i32 = arith.constant 0 : i32
    %c0_i32_0 = arith.constant 0 : i32
    %c0_i32_1 = arith.constant 0 : i32
    return %c0_i32, %c0_i32_0 : i32, i32
  }
  func.func @transform_4(%arg0: i32) -> (i32, i32) {
    %c0_i32 = arith.constant 0 : i32
    %c0_i32_0 = arith.constant 0 : i32
    %c0_i32_1 = arith.constant 0 : i32
    return %c0_i32, %c0_i32_0 : i32, i32
  }
  func.func @transform_5(%arg0: i32) -> (i32, i32) {
    %c0_i32 = arith.constant 0 : i32
    %c0_i32_0 = arith.constant 0 : i32
    %c0_i32_1 = arith.constant 0 : i32
    return %c0_i32, %c0_i32_0 : i32, i32
  }
  func.func @transform_6(%arg0: i32) -> (i32, i32) {
    %c0_i32 = arith.constant 0 : i32
    %c0_i32_0 = arith.constant 0 : i32
    %c0_i32_1 = arith.constant 0 : i32
    return %c0_i32, %c0_i32_0 : i32, i32
  }
  func.func @transform_7(%arg0: i32) -> (i32, i32) {
    %c0_i32 = arith.constant 0 : i32
    %c0_i32_0 = arith.constant 0 : i32
    %c0_i32_1 = arith.constant 0 : i32
    return %c0_i32, %c0_i32_0 : i32, i32
  }
  func.func @transform_8(%arg0: i32) -> (i32, i32) {
    %c0_i32 = arith.constant 0 : i32
    %c0_i32_0 = arith.constant 0 : i32
    return %arg0, %c0_i32 : i32, i32
  }
}

</mosaic_0001>

<bundles_post_ra>
// kernel: tpu_custom_call.1
= control target key start
LH: loop header
LB: loop body
LE: loop exit
PB: predicated region body
PF: predicated region fallthrough
CT: control target
= control target key end

     0   :  { %13 = vsyncpa [#allocation3], 0  ;;  %s2780_s0 = inlined_call_operand.vmem [shape: f32[256,48], index: 0, kind: input, shape index: {}]   ;;  %s2781_s1 = inlined_call_operand.vmem [shape: f32[256,8], index: 1, kind: input, shape index: {}]   ;;  %s2782_s2 = inlined_call_operand.vmem [shape: f32[256,16], index: 2, kind: input, shape index: {}]   ;;  %s2783_s3 = inlined_call_operand.vmem [shape: f32[48,128], index: 3, kind: input, shape index: {}]   ;;  %s2784_s4 = inlined_call_operand.vmem [shape: f32[8,128], index: 4, kind: input, shape index: {}]   ;;  %s2785_s5 = inlined_call_operand.vmem [shape: f32[1,128], index: 5, kind: input, shape index: {}]   ;;  %s2786_s6 = inlined_call_operand.vmem [shape: f32[128,128], index: 6, kind: input, shape index: {}]   ;;  %s2787_s7 = inlined_call_operand.vmem [shape: f32[1,128], index: 7, kind: input, shape index: {}]   ;;  %s2788_s8 = inlined_call_operand.hbm [shape: f32[256,128], index: 8, kind: output, shape index: {}]  }
   0x1   :  { %15 = vsyncpa [#allocation3 + $0x1], 0  ;;  %s2047_s27 = smov 0   ;;  %s2049_s28 = smov 0  }
   0x2   :  { %s2051_s29 = smov 0   ;;  %s2053_s30 = smov 0  }
   0x3 LB: > { %s2068_s9 = sadd.s32 4294967295, %s1993_s30   ;;  %s1552_s10 = sadd.s32 4294967294, %s1993_s30   ;;  %s1993_s30 = sphi %s2053_s30, %s2794_s30   ;;  %s1989_s29 = sphi %s2051_s29, %s2793_s29   ;;  %s1985_s28 = sphi %s2049_s28, %s2792_s28   ;;  %s1981_s27 = sphi %s2047_s27, %s2791_s27  }
   0x4   : > { %s2072_s11 = sadd.s32 1, %s1993_s30   ;;  %s211_s12 = sadd.s32 1, %s1989_s29 }
   0x5   : > { %s208_s13 = ssub.s32 %s1993_s30, %s2072_s11  ;;  %p221_p0 = scmp.ne.s32.totalorder %s1989_s29, %s1985_s28 }
   0x6   : > { %p209_p1 = scmp.eq.s32.totalorder %s208_s13, 0  ;;  %p222_p2 = scmp.eq.s32.totalorder %s2068_s9, 1 }
   0x7   : > { %p227_p3 = scmp.ne.s32.totalorder %s1985_s28, %s1981_s27  ;;  %p228_p4 = scmp.eq.s32.totalorder %s1552_s10, 1 }
   0x8   : > { %s2083_s14 = scalar_select %p209_p1, %s1989_s29, %s211_s12  }
   0x9   : > { %p2085_p5 = por %p222_p2, %p221_p0  ;;  %p2089_p6 = por %p228_p4, %p227_p3 }
   0xa   : > { %p1555_p7 = scmp.ge.s32.totalorder %s1993_s30, 1  ;;  %p288_p8 = scmp.lt.s32.totalorder %s1993_s30, 3 }
   0xc   : > { %p289_p9 = pnand %p1555_p7, %p288_p8 }
   0xd   : > { %s1557_s21 = sshll.u32 (!%p289_p9), %s2068_s9, 4  ;;  %s1995_s10 = smov (!%p289_p9), 16  }
   0xe   : > { %292 = sbr.rel (%p289_p9) target bundleno = 744 (0x2e8), region = 52  ;;  %p333_p10 = scmp.lt.s32.totalorder (!%p289_p9), %s1557_s21, 31 }
   0xf   : > { %s329_s13 = sand.u32 (!%p289_p9), 1, %s1985_s28   ;;  %s1998_s24 = smov (!%p289_p9), 32  }
  0x10   : > { %s1556_s18 = sshll.u32 (!%p289_p9), %s329_s13, 7  ;;  %s1602_s25 = sshll.u32 (!%p289_p9), %s2068_s9, 11 }
  0x11   : > { %s2289_s19 = scalar_lea.vmem (!%p289_p9), [#allocation2], %s1556_s18  ;;  %s2740_s9 = scalar_lea.sflag (!%p289_p9), [#allocation3], %s329_s13 }
  0x12   : > { %s1466_s26 = sshll.u32 (!%p289_p9), %s2289_s19, 4  ;;  %s1999_s18 = smov (!%p289_p9), [#allocation2]   ;;  %s2732_s26 = int_to_ptr.vmem [resolvable:$true] %s1466_s26 }
  0x13   : > { %v372_v0 = vld [vmem:[%s2783_s3 + $0x28] sm:$0xff]  ;;  %v371_v1 = vld [vmem:[%s2783_s3 + $0x20] sm:$0xff]  ;;  %v370_v3 = vld [vmem:[%s2783_s3 + $0x18] sm:$0xff]  ;;  %s2796_s21 = smov (!%p333_p10, %s1557_s21), 31  ;;  %vm390_vm0 = vcmask 64512   ;;  %vm584_vm1 = vcmask 392192  }
  0x14   : > { %1700 = vmatprep.subr.mxu1 %v372_v0  ;;  %v389_v2 = vld [vmem:[%s2784_s4] sm:$0xff]  ;;  %v832_v4 = vld [vmem:[%s2786_s6 + $0x78] sm:$0xff]  ;;  %v369_v5 = vld [vmem:[%s2783_s3 + $0x10] sm:$0xff]  ;;  %s2114_s17 = sshll.u32 %s2796_s21, 3  ;;  %vm1337_vm2 = vcmask 130048   ;;  %vm1354_vm3 = vcmask 261248  }
  0x15   : > { %1701 = vmatpush3.msra.mxu1 %v372_v0  ;;  %1674 = vmatprep.subr.mxu0 %v389_v2  ;;  %v368_v6 = vld [vmem:[%s2783_s3 + $0x8] sm:$0xff]  ;;  %s2123_s23 = scalar_lea.vmem %s2781_s1, %s2114_s17  ;;  %s2129_s21 = scalar_lea.vmem %s2780_s0, %s2114_s17  ;;  %v367_v10 = vld [vmem:[%s2783_s3] sm:$0xff]  ;;  %v831_v16 = vld [vmem:[%s2786_s6 + $0x70] sm:$0xff] }
  0x16   : > { %1702 = vmatprep.subr.mxu1 %v371_v1  ;;  %1675 = vmatpush3.msra.mxu0 %v389_v2  ;;  %v373_v7 = vld [vmem:[%s2123_s23] sm:$0xff]  ;;  %v374_v8 = vld [vmem:[%s2123_s23 + $0x8] sm:$0xff]  ;;  %v375_v11 = vld [vmem:[%s2123_s23 + $0x10] sm:$0xff]  ;;  %s1933_s12 = scalar_lea.vmem %s2732_s26, 2048  ;;  %s1937_s20 = sshll.u32 %s1999_s18, 4  ;;  %s1938_s20 = int_to_ptr.vmem [resolvable:$false] %s1937_s20 }
  0x17   : > { %1703 = vmatpush3.msra.mxu1 %v371_v1  ;;  %1736 = vmatprep.subr.mxu0 %v832_v4  ;;  %v351_v9 = vld [vmem:[%s2129_s21] sm:$0xff]  ;;  %v352_v12 = vld [vmem:[%s2129_s21 + $0x8] sm:$0xff]  ;;  %v376_v13 = vld [vmem:[%s2123_s23 + $0x18] sm:$0xff]  ;;  %p1934_p11 = scmp.ne.s32.totalorder %s2732_s26, %s1933_s12  ;;  %s1939_s22 = scalar_lea.vmem %s1938_s20, 4096 }
  0x18   : > { %1704 = vmatprep.subr.mxu1 %v370_v3  ;;  %1676 = vmatprep.mubr.msk.f32.mxu0 %vm390_vm0, %v373_v7  ;;  %v353_v14 = vld [vmem:[%s2129_s21 + $0x10] sm:$0xff]  ;;  %v377_v15 = vld [vmem:[%s2123_s23 + $0x20] sm:$0xff]  ;;  %v354_v17 = vld [vmem:[%s2129_s21 + $0x18] sm:$0xff]  ;;  %p1940_p0 = scmp.lt.s32.totalorder %s2732_s26, %s1938_s20  ;;  %p1941_p1 = scmp.lt.s32.totalorder %s1939_s22, %s1933_s12 }
  0x19   : > { %1705 = vmatpush3.msra.mxu1 %v370_v3  ;;  %1677 = vmatmul.mubr.msk.f32.vlgmr.msra.gmra.mxu0 %vm390_vm0, %v374_v8  ;;  %v378_v18 = vld [vmem:[%s2123_s23 + $0x28] sm:$0xff]  ;;  %v355_v19 = vld [vmem:[%s2129_s21 + $0x20] sm:$0xff]  ;;  %v379_v20 = vld [vmem:[%s2123_s23 + $0x30] sm:$0xff]  ;;  %p1935_p12 = pnand %p1934_p11, %p2085_p5 }
  0x1a   : > { %1706 = vmatprep.subr.mxu1 %v369_v5  ;;  %1712 = vmatprep.mubr.msk.f32.mxu1 %vm584_vm1, %v351_v9  ;;  %v830_v21 = vld [vmem:[%s2786_s6 + $0x68] sm:$0xff]  ;;  %v380_v23 = vld [vmem:[%s2123_s23 + $0x38] sm:$0xff]  ;;  %v357_v24 = vld [vmem:[%s2129_s21 + $0x30] sm:$0xff]  ;;  %p1942_p2 = por %p1941_p1, %p1940_p0 }
  0x1b   : > { %1707 = vmatpush3.msra.mxu1 %v369_v5  ;;  %1679 = vmatprep.mubr.msk.f32.mxu0 %vm390_vm0, %v375_v11  ;;  %v356_v22 = vld [vmem:[%s2129_s21 + $0x28] sm:$0xff]  ;;  %v381_v25 = vld [vmem:[%s2123_s23 + $0x40] sm:$0xff]  ;;  %v358_v27 = vld [vmem:[%s2129_s21 + $0x38] sm:$0xff]  ;;  %p1936_p13 = pneg %p1935_p12 }
  0x1c   : > { %1708 = vmatprep.subr.mxu1 %v368_v6  ;;  %1737 = vmatpush3.msra.mxu0 %v832_v4  ;;  %v829_v26 = vld [vmem:[%s2786_s6 + $0x60] sm:$0xff]  ;;  %v382_v28 = vld [vmem:[%s2123_s23 + $0x48] sm:$0xff]  ;;  %v383_v30 = vld [vmem:[%s2123_s23 + $0x50] sm:$0xff] }
  0x1d   : > { %1709 = vmatpush3.msra.mxu1 %v368_v6  ;;  %1680 = vmatmul.mubr.msk.f32.gmra.mxu0 %vm390_vm0, %v376_v13  ;;  %v359_v29 = vld [vmem:[%s2129_s21 + $0x40] sm:$0xff]  ;;  %v828_v31 = vld [vmem:[%s2786_s6 + $0x58] sm:$0xff]  ;;  %v360_v32 = vld [vmem:[%s2129_s21 + $0x48] sm:$0xff]  ;;  %p1943_p3 = pnand %p1942_p2, %p1936_p13 }
  0x1e   : > { %1710 = vmatprep.subr.mxu1 %v367_v10  ;;  %1682 = vmatprep.mubr.msk.f32.mxu0 %vm390_vm0, %v377_v15  ;;  %v384_v33 = vld [vmem:[%s2123_s23 + $0x58] sm:$0xff]  ;;  %v361_v34 = vld [vmem:[%s2129_s21 + $0x50] sm:$0xff]  ;;  %v385_v35 = vld [vmem:[%s2123_s23 + $0x60] sm:$0xff] }
  0x1f   : > { %1711 = vmatpush3.msra.mxu1 %v367_v10  ;;  %1738 = vmatprep.subr.mxu0 %v831_v16  ;;  %v827_v36 = vld [vmem:[%s2786_s6 + $0x50] sm:$0xff]  ;;  %v362_v37 = vld [vmem:[%s2129_s21 + $0x58] sm:$0xff]  ;;  %v386_v38 = vld [vmem:[%s2123_s23 + $0x68] sm:$0xff] }
  0x20   : > { %1713 = vmatmul.mubr.msk.f32.vlgmr.msra.gmra.mxu1 %vm584_vm1, %v352_v12  ;;  %1792 = vmatprep.subr.mxu1 %v832_v4  ;;  %v363_v39 = vld [vmem:[%s2129_s21 + $0x60] sm:$0xff]  ;;  %v387_v40 = vld [vmem:[%s2123_s23 + $0x70] sm:$0xff]  ;;  %v826_v41 = vld [vmem:[%s2786_s6 + $0x48] sm:$0xff] }
  0x21   : > { %1715 = vmatprep.mubr.msk.f32.mxu1 %vm584_vm1, %v353_v14  ;;  %1739 = vmatpush3.msra.mxu0 %v831_v16  ;;  %v364_v42 = vld [vmem:[%s2129_s21 + $0x68] sm:$0xff]  ;;  %v388_v43 = vld [vmem:[%s2123_s23 + $0x78] sm:$0xff]  ;;  %v365_v44 = vld [vmem:[%s2129_s21 + $0x70] sm:$0xff]  ;;  %s1997_s23 = smov 112  }
  0x22   : > { %1808 = vmatpush3.msra.mxu1 %v832_v4  ;;  %1683 = vmatmul.mubr.msk.f32.gmra.mxu0 %vm390_vm0, %v378_v18  ;;  %v825_v45 = vld [vmem:[%s2786_s6 + $0x40] sm:$0xff]  ;;  %v824_v46 = vld [vmem:[%s2786_s6 + $0x38] sm:$0xff]  ;;  %v823_v48 = vld [vmem:[%s2786_s6 + $0x30] sm:$0xff] }
  0x23   : > { %1685 = vmatprep.mubr.msk.f32.mxu0 %vm390_vm0, %v379_v20  ;;  %1740 = vmatprep.subr.mxu0 %v830_v21  ;;  %v366_v47 = vld [vmem:[%s2129_s21 + $0x78] sm:$0xff]  ;;  %v822_v49 = vld [vmem:[%s2786_s6 + $0x28] sm:$0xff]  ;;  %v821_v50 = vld [vmem:[%s2786_s6 + $0x20] sm:$0xff]  ;;  %s2247_s21 = scalar_lea.vmem %s2782_s2, %s2114_s17  ;;  %s2730_s17 = scalar_lea.hbm %s2788_s8, %s1602_s25 }
  0x24   : > { %1716 = vmatmul.mubr.msk.f32.gmra.mxu1 %vm584_vm1, %v354_v17  ;;  %1793 = vmatprep.subr.mxu1 %v831_v16  ;;  %v820_v51 = vld [vmem:[%s2786_s6 + $0x18] sm:$0xff]  ;;  %v819_v52 = vld [vmem:[%s2786_s6 + $0x10] sm:$0xff]  ;;  %v818_v53 = vld [vmem:[%s2786_s6 + $0x8] sm:$0xff] }
  0x25   : > { %1718 = vmatprep.mubr.msk.f32.mxu1 %vm584_vm1, %v355_v19  ;;  %1741 = vmatpush3.msra.mxu0 %v830_v21  ;;  %v817_v54 = vld [vmem:[%s2786_s6] sm:$0xff]  ;;  %v1147_v56 = vld [vmem:[%s2247_s21 + $0x10] sm:$0xff]  ;;  %v1146_v57 = vld [vmem:[%s2247_s21 + $0x8] sm:$0xff] }
  0x26   : > { %1809 = vmatpush3.msra.mxu1 %v831_v16  ;;  %1686 = vmatmul.mubr.msk.f32.gmra.mxu0 %vm390_vm0, %v380_v23  ;;  %v1145_v55 = vld [vmem:[%s2247_s21] sm:$0xff]  ;;  %v1148_v58 = vld [vmem:[%s2247_s21 + $0x18] sm:$0xff]  ;;  %v1150_v59 = vld [vmem:[%s2247_s21 + $0x28] sm:$0xff] }
  0x27   : > { %1688 = vmatprep.mubr.msk.f32.mxu0 %vm390_vm0, %v381_v25  ;;  %1742 = vmatprep.subr.mxu0 %v829_v26  ;;  %v1149_v60 = vld [vmem:[%s2247_s21 + $0x20] sm:$0xff]  ;;  %v1152_v61 = vld [vmem:[%s2247_s21 + $0x38] sm:$0xff]  ;;  %v1151_v62 = vld [vmem:[%s2247_s21 + $0x30] sm:$0xff] }
  0x28   : > { %1719 = vmatmul.mubr.msk.f32.gmra.mxu1 %vm584_vm1, %v356_v22  ;;  %1794 = vmatprep.subr.mxu1 %v830_v21  ;;  %v1154_v63 = vld [vmem:[%s2247_s21 + $0x48] sm:$0xff]  ;;  %v1153_v0 = vld [vmem:[%s2247_s21 + $0x40] sm:$0xff]  ;;  %v1156_v1 = vld [vmem:[%s2247_s21 + $0x58] sm:$0xff] }
  0x29   : > { %1721 = vmatprep.mubr.msk.f32.mxu1 %vm584_vm1, %v357_v24  ;;  %1743 = vmatpush3.msra.mxu0 %v829_v26  ;;  %v1155_v2 = vld [vmem:[%s2247_s21 + $0x50] sm:$0xff]  ;;  %v1158_v3 = vld [vmem:[%s2247_s21 + $0x68] sm:$0xff]  ;;  %v1157_v4 = vld [vmem:[%s2247_s21 + $0x60] sm:$0xff] }
  0x2a   : > { %1810 = vmatpush3.msra.mxu1 %v830_v21  ;;  %1689 = vmatmul.mubr.msk.f32.gmra.mxu0 %vm390_vm0, %v382_v28  ;;  %v1160_v5 = vld [vmem:[%s2247_s21 + $0x78] sm:$0xff]  ;;  %v1159_v6 = vld [vmem:[%s2247_s21 + $0x70] sm:$0xff]  ;;  %v2268_v12 = vld [vmem:[%s2785_s5] ss:$0 sm:$0xff] }
  0x2b   : > { %1691 = vmatprep.mubr.msk.f32.mxu0 %vm390_vm0, %v383_v30  ;;  %1744 = vmatprep.subr.mxu0 %v828_v31 }
  0x2c   : > { %1722 = vmatmul.mubr.msk.f32.gmra.mxu1 %vm584_vm1, %v358_v27  ;;  %1795 = vmatprep.subr.mxu1 %v829_v26 }
  0x2d   : > { %1724 = vmatprep.mubr.msk.f32.mxu1 %vm584_vm1, %v359_v29  ;;  %1745 = vmatpush3.msra.mxu0 %v828_v31 }
  0x2e   : > { %1811 = vmatpush3.msra.mxu1 %v829_v26  ;;  %1692 = vmatmul.mubr.msk.f32.gmra.mxu0 %vm390_vm0, %v384_v33 }
  0x2f   : > { %1694 = vmatprep.mubr.msk.f32.mxu0 %vm390_vm0, %v385_v35  ;;  %1746 = vmatprep.subr.mxu0 %v827_v36 }
  0x30   : > { %1725 = vmatmul.mubr.msk.f32.gmra.mxu1 %vm584_vm1, %v360_v32  ;;  %1796 = vmatprep.subr.mxu1 %v828_v31 }
  0x31   : > { %1727 = vmatprep.mubr.msk.f32.mxu1 %vm584_vm1, %v361_v34  ;;  %1747 = vmatpush3.msra.mxu0 %v827_v36 }
  0x32   : > { %1812 = vmatpush3.msra.mxu1 %v828_v31  ;;  %1695 = vmatmul.mubr.msk.f32.gmra.mxu0 %vm390_vm0, %v386_v38 }
  0x33   : > { %1697 = vmatprep.mubr.msk.f32.mxu0 %vm390_vm0, %v387_v40  ;;  %1748 = vmatprep.subr.mxu0 %v826_v41 }
  0x34   : > { %1728 = vmatmul.mubr.msk.f32.gmra.mxu1 %vm584_vm1, %v362_v37  ;;  %1797 = vmatprep.subr.mxu1 %v827_v36 }
  0x35   : > { %1730 = vmatprep.mubr.msk.f32.mxu1 %vm584_vm1, %v363_v39  ;;  %1749 = vmatpush3.msra.mxu0 %v826_v41 }
  0x36   : > { %1813 = vmatpush3.msra.mxu1 %v827_v36  ;;  %1698 = vmatmul.mubr.msk.f32.gmra.mxu0 %vm390_vm0, %v388_v43 }
  0x37   : > { %1750 = vmatprep.subr.mxu0 %v825_v45  ;;  %1798 = vmatprep.subr.mxu1 %v826_v41 }
  0x38   : > { %1731 = vmatmul.mubr.msk.f32.gmra.mxu1 %vm584_vm1, %v364_v42  ;;  %1751 = vmatpush3.msra.mxu0 %v825_v45 }
  0x39   : > { %1733 = vmatprep.mubr.msk.f32.mxu1 %vm584_vm1, %v365_v44  ;;  %1752 = vmatprep.subr.mxu0 %v824_v46 }
  0x3a   : > { %1814 = vmatpush3.msra.mxu1 %v826_v41  ;;  %1753 = vmatpush3.msra.mxu0 %v824_v46 }
  0x3b   : > { %1754 = vmatprep.subr.mxu0 %v823_v48  ;;  %1799 = vmatprep.subr.mxu1 %v825_v45 }
  0x3c   : > { %1734 = vmatmul.mubr.msk.f32.gmra.mxu1 %vm584_vm1, %v366_v47  ;;  %1755 = vmatpush3.msra.mxu0 %v823_v48 }
  0x3d   : > { %1815 = vmatpush3.msra.mxu1 %v825_v45  ;;  %1756 = vmatprep.subr.mxu0 %v822_v49 }
  0x3e   : > { %1800 = vmatprep.subr.mxu1 %v824_v46  ;;  %1757 = vmatpush3.msra.mxu0 %v822_v49 }
  0x3f   : > { %1816 = vmatpush3.msra.mxu1 %v824_v46  ;;  %1758 = vmatprep.subr.mxu0 %v821_v50 }
  0x40   : > { %1801 = vmatprep.subr.mxu1 %v823_v48  ;;  %1759 = vmatpush3.msra.mxu0 %v821_v50 }
  0x41   : > { %1817 = vmatpush3.msra.mxu1 %v823_v48  ;;  %1760 = vmatprep.subr.mxu0 %v820_v51 }
  0x42   : > { %1802 = vmatprep.subr.mxu1 %v822_v49  ;;  %1761 = vmatpush3.msra.mxu0 %v820_v51 }
  0x43   : > { %1818 = vmatpush3.msra.mxu1 %v822_v49  ;;  %1762 = vmatprep.subr.mxu0 %v819_v52 }
  0x44   : > { %1803 = vmatprep.subr.mxu1 %v821_v50  ;;  %1763 = vmatpush3.msra.mxu0 %v819_v52 }
  0x45   : > { %1819 = vmatpush3.msra.mxu1 %v821_v50  ;;  %1764 = vmatprep.subr.mxu0 %v818_v53 }
  0x46   : > { %1804 = vmatprep.subr.mxu1 %v820_v51  ;;  %1765 = vmatpush3.msra.mxu0 %v818_v53 }
  0x47   : > { %1820 = vmatpush3.msra.mxu1 %v820_v51  ;;  %1766 = vmatprep.subr.mxu0 %v817_v54 }
  0x48   : > { %1805 = vmatprep.subr.mxu1 %v819_v52  ;;  %1767 = vmatpush3.msra.mxu0 %v817_v54 }
  0x49   : > { %1821 = vmatpush3.msra.mxu1 %v819_v52  ;;  %1177 = vrot.lane.b32.xlu0 %v1145_v55, %s1995_s10 }
  0x4a   : > { %1806 = vmatprep.subr.mxu1 %v818_v53  ;;  %1181 = vrot.lane.b32.xlu1 %v1147_v56, %s1995_s10 }
  0x4b   : > { %1822 = vmatpush3.msra.mxu1 %v818_v53 }
  0x4c   : > { %1807 = vmatprep.subr.mxu1 %v817_v54 }
  0x4d   : > { %1823 = vmatpush3.msra.mxu1 %v817_v54  ;;  %1179 = vrot.lane.b32.xlu0 %v1146_v57, %s1995_s10 }
  0x4e   : > { %1183 = vrot.lane.b32.xlu1 %v1148_v58, %s1995_s10 }
  0x51   : > { %1185 = vrot.lane.b32.xlu0 %v1149_v60, %s1995_s10 }
  0x52   : > { %1187 = vrot.lane.b32.xlu1 %v1150_v59, %s1995_s10 }
  0x55   : > { %1189 = vrot.lane.b32.xlu0 %v1151_v62, %s1995_s10 }
  0x56   : > { %1191 = vrot.lane.b32.xlu1 %v1152_v61, %s1995_s10 }
  0x59   : > { %1193 = vrot.lane.b32.xlu0 %v1153_v0, %s1995_s10 }
  0x5a   : > { %1195 = vrot.lane.b32.xlu1 %v1154_v63, %s1995_s10 }
  0x5d   : > { %1197 = vrot.lane.b32.xlu0 %v1155_v2, %s1995_s10 }
  0x5e   : > { %1199 = vrot.lane.b32.xlu1 %v1156_v1, %s1995_s10 }
  0x61   : > { %1201 = vrot.lane.b32.xlu0 %v1157_v4, %s1995_s10 }
  0x62   : > { %1203 = vrot.lane.b32.xlu1 %v1158_v3, %s1995_s10 }
  0x65   : > { %1205 = vrot.lane.b32.xlu0 %v1159_v6, %s1995_s10 }
  0x66   : > { %1207 = vrot.lane.b32.xlu1 %v1160_v5, %s1995_s10 }
  0xd9   : > { %v1678_v7 = vpop.f32.mrf.mxu0 }
  0xdb   : > { %v505_v8 = vpop.f32.mrf.mxu0 }
  0xdd   : > { %v1681_v10 = vpop.f32.mrf.mxu0 }
  0xdf   : > { %v515_v14 = vpop.f32.mrf.mxu0 }
  0xe0   : > { %v1714_v9 = vpop.f32.mrf.mxu1 }
  0xe1   : > { %v705_v11 = vadd.f32 %v1714_v9, %v1678_v7 }
  0xe2   : > { %v699_v13 = vpop.f32.mrf.mxu1  ;;  %v1684_v18 = vpop.f32.mrf.mxu0 }
  0xe3   : > { %v700_v15 = vadd.f32 %v699_v13, %v505_v8  ;;  %v786_v16 = vadd.f32 %v2268_v12, %v705_v11 }
  0xe4   : > { %v1717_v17 = vpop.f32.mrf.mxu1  ;;  %v525_v22 = vpop.f32.mrf.mxu0 }
  0xe5   : > { %v785_v19 = vadd.f32 %v2268_v12, %v700_v15  ;;  %v715_v20 = vadd.f32 %v1717_v17, %v1681_v10  ;;  %v802_v25 = vmax.f32 %v786_v16, 0.0 }
  0xe6   : > { %v709_v21 = vpop.f32.mrf.mxu1  ;;  %v1687_v28 = vpop.f32.mrf.mxu0 }
  0xe7   : > { %v801_v23 = vmax.f32 %v785_v19, 0.0  ;;  %v710_v24 = vadd.f32 %v709_v21, %v515_v14  ;;  %v788_v26 = vadd.f32 %v2268_v12, %v715_v20 }
  0xe8   : > { %v1720_v27 = vpop.f32.mrf.mxu1  ;;  %v535_v32 = vpop.f32.mrf.mxu0 }
  0xe9   : > { %v787_v29 = vadd.f32 %v2268_v12, %v710_v24  ;;  %v725_v30 = vadd.f32 %v1720_v27, %v1684_v18  ;;  %1768 = vmatprep.mubr.f32.mxu0 %v801_v23  ;;  %v804_v35 = vmax.f32 %v788_v26, 0.0 }
  0xea   : > { %v719_v31 = vpop.f32.mrf.mxu1  ;;  %1769 = vmatmul.mubr.f32.vlgmr.msra.gmra.mxu0 %v802_v25  ;;  %v1690_v38 = vpop.f32.mrf.mxu0  ;;  %v2310_v25 = vld [vmem:[%s2787_s7] ss:$0 sm:$0xff] }
  0xeb   : > { %v803_v33 = vmax.f32 %v787_v29, 0.0  ;;  %v720_v34 = vadd.f32 %v719_v31, %v525_v22  ;;  %v790_v36 = vadd.f32 %v2268_v12, %v725_v30 }
  0xec   : > { %v1723_v37 = vpop.f32.mrf.mxu1  ;;  %v545_v42 = vpop.f32.mrf.mxu0 }
  0xed   : > { %v789_v39 = vadd.f32 %v2268_v12, %v720_v34  ;;  %v735_v40 = vadd.f32 %v1723_v37, %v1687_v28  ;;  %1771 = vmatprep.mubr.f32.mxu0 %v803_v33  ;;  %v806_v45 = vmax.f32 %v790_v36, 0.0 }
  0xee   : > { %v729_v41 = vpop.f32.mrf.mxu1  ;;  %1772 = vmatmul.mubr.f32.gmra.mxu0 %v804_v35  ;;  %v1693_v48 = vpop.f32.mrf.mxu0 }
  0xef   : > { %v805_v43 = vmax.f32 %v789_v39, 0.0  ;;  %v730_v44 = vadd.f32 %v729_v41, %v535_v32  ;;  %v792_v46 = vadd.f32 %v2268_v12, %v735_v40 }
  0xf0   : > { %v1726_v47 = vpop.f32.mrf.mxu1  ;;  %v555_v52 = vpop.f32.mrf.mxu0 }
  0xf1   : > { %v791_v49 = vadd.f32 %v2268_v12, %v730_v44  ;;  %v745_v50 = vadd.f32 %v1726_v47, %v1690_v38  ;;  %1774 = vmatprep.mubr.f32.mxu0 %v805_v43  ;;  %v808_v55 = vmax.f32 %v792_v46, 0.0 }
  0xf2   : > { %v739_v51 = vpop.f32.mrf.mxu1  ;;  %1775 = vmatmul.mubr.f32.gmra.mxu0 %v806_v45  ;;  %v1696_v58 = vpop.f32.mrf.mxu0 }
  0xf3   : > { %v807_v53 = vmax.f32 %v791_v49, 0.0  ;;  %v740_v54 = vadd.f32 %v739_v51, %v545_v42  ;;  %v794_v56 = vadd.f32 %v2268_v12, %v745_v50 }
  0xf4   : > { %v1729_v57 = vpop.f32.mrf.mxu1  ;;  %v565_v62 = vpop.f32.mrf.mxu0 }
  0xf5   : > { %v793_v59 = vadd.f32 %v2268_v12, %v740_v54  ;;  %v755_v60 = vadd.f32 %v1729_v57, %v1693_v48  ;;  %1777 = vmatprep.mubr.f32.mxu0 %v807_v53  ;;  %v810_v1 = vmax.f32 %v794_v56, 0.0 }
  0xf6   : > { %v749_v61 = vpop.f32.mrf.mxu1  ;;  %1778 = vmatmul.mubr.f32.gmra.mxu0 %v808_v55  ;;  %v1699_v6 = vpop.f32.mrf.mxu0 }
  0xf7   : > { %v809_v63 = vmax.f32 %v793_v59, 0.0  ;;  %v750_v0 = vadd.f32 %v749_v61, %v555_v52  ;;  %v796_v2 = vadd.f32 %v2268_v12, %v755_v60 }
  0xf8   : > { %v1732_v3 = vpop.f32.mrf.mxu1  ;;  %v575_v16 = vpop.f32.mrf.mxu0 }
  0xf9   : > { %v795_v4 = vadd.f32 %v2268_v12, %v750_v0  ;;  %v765_v5 = vadd.f32 %v1732_v3, %v1696_v58  ;;  %1780 = vmatprep.mubr.f32.mxu0 %v809_v63  ;;  %v812_v10 = vmax.f32 %v796_v2, 0.0 }
  0xfa   : > { %v759_v7 = vpop.f32.mrf.mxu1  ;;  %1781 = vmatmul.mubr.f32.gmra.mxu0 %v810_v1 }
  0xfb   : > { %v811_v8 = vmax.f32 %v795_v4, 0.0  ;;  %v760_v9 = vadd.f32 %v759_v7, %v565_v62  ;;  %v798_v11 = vadd.f32 %v2268_v12, %v765_v5 }
  0xfc   : > { %v1735_v13 = vpop.f32.mrf.mxu1 }
  0xfd   : > { %v797_v14 = vadd.f32 %v2268_v12, %v760_v9  ;;  %v775_v15 = vadd.f32 %v1735_v13, %v1699_v6  ;;  %1783 = vmatprep.mubr.f32.mxu0 %v811_v8  ;;  %v814_v20 = vmax.f32 %v798_v11, 0.0  ;;  %v2415_v8 = vpop.permute.xlu1 %1181 }
  0xfe   : > { %v769_v17 = vpop.f32.mrf.mxu1  ;;  %1784 = vmatmul.mubr.f32.gmra.mxu0 %v812_v10 }
  0xff   : > { %v813_v18 = vmax.f32 %v797_v14, 0.0  ;;  %v770_v19 = vadd.f32 %v769_v17, %v575_v16  ;;  %v800_v21 = vadd.f32 %v2268_v12, %v775_v15 }
 0x101   : > { %v799_v22 = vadd.f32 %v2268_v12, %v770_v19  ;;  %1786 = vmatprep.mubr.f32.mxu1 %v813_v18  ;;  %v816_v24 = vmax.f32 %v800_v21, 0.0  ;;  %v1996_v12 = vmov 0.0  }
 0x102   : > { %1787 = vmatmul.mubr.f32.vlgmr.msra.gmra.mxu1 %v814_v20  ;;  %1322 = vst [vmem:[%s2289_s19 + $0x8] sm:$0xff] %v1996_v12  ;;  %1321 = vst [vmem:[%s2289_s19] sm:$0xff] %v1996_v12  ;;  %v2443_v20 = vpop.permute.xlu0 %1177 }
 0x103   : > { %v815_v23 = vmax.f32 %v799_v22, 0.0  ;;  %1323 = vst [vmem:[%s2289_s19 + $0x10] sm:$0xff] %v1996_v12  ;;  %1324 = vst [vmem:[%s2289_s19 + $0x18] sm:$0xff] %v1996_v12 }
 0x104   : > { %1325 = vst [vmem:[%s2289_s19 + $0x20] sm:$0xff] %v1996_v12  ;;  %1326 = vst [vmem:[%s2289_s19 + $0x28] sm:$0xff] %v1996_v12 }
 0x105   : > { %1789 = vmatprep.mubr.f32.mxu1 %v815_v23  ;;  %1327 = vst [vmem:[%s2289_s19 + $0x30] sm:$0xff] %v1996_v12  ;;  %1328 = vst [vmem:[%s2289_s19 + $0x38] sm:$0xff] %v1996_v12 }
 0x106   : > { %1790 = vmatmul.mubr.f32.gmra.mxu1 %v816_v24  ;;  %1329 = vst [vmem:[%s2289_s19 + $0x40] sm:$0xff] %v1996_v12  ;;  %1330 = vst [vmem:[%s2289_s19 + $0x48] sm:$0xff] %v1996_v12 }
 0x107   : > { %1331 = vst [vmem:[%s2289_s19 + $0x50] sm:$0xff] %v1996_v12  ;;  %1332 = vst [vmem:[%s2289_s19 + $0x58] sm:$0xff] %v1996_v12 }
 0x108   : > { %1333 = vst [vmem:[%s2289_s19 + $0x60] sm:$0xff] %v1996_v12  ;;  %1334 = vst [vmem:[%s2289_s19 + $0x68] sm:$0xff] %v1996_v12 }
 0x109   : > { %1335 = vst [vmem:[%s2289_s19 + $0x70] sm:$0xff] %v1996_v12  ;;  %1336 = vst [vmem:[%s2289_s19 + $0x78] sm:$0xff] %v1996_v12 }
 0x1aa   : > { %v1770_v26 = vpop.f32.mrf.mxu0 }
 0x1ab   : > { %v2313_v27 = vadd.f32 %v1770_v26, %v2310_v25  ;;  %v2458_v26 = vpop.permute.xlu1 %1183 }
 0x1ac   : > { %v906_v28 = vpop.f32.mrf.mxu0 }
 0x1ad   : > { %v987_v29 = vmul.f32 1.442695, %v2313_v27  ;;  %1339 = vst.msk [vmem:[%s2289_s19 + $0x8] sm:$0xff] %vm1337_vm2, %v2313_v27  ;;  %v2320_v30 = vadd.f32 %v2310_v25, %v906_v28 }
 0x1ae   : > { %v1773_v31 = vpop.f32.mrf.mxu0 }
 0x1af   : > { %1869 = vpow2.f32 %v987_v29  ;;  %v985_v32 = vmul.f32 1.442695, %v2320_v30  ;;  %1338 = vst.msk [vmem:[%s2289_s19] sm:$0xff] %vm1337_vm2, %v2320_v30  ;;  %v2327_v33 = vadd.f32 %v1773_v31, %v2310_v25 }
 0x1b0   : > { %v916_v34 = vpop.f32.mrf.mxu0 }
 0x1b1   : > { %1871 = vpow2.f32 %v985_v32  ;;  %v991_v35 = vmul.f32 1.442695, %v2327_v33  ;;  %1341 = vst.msk [vmem:[%s2289_s19 + $0x18] sm:$0xff] %vm1337_vm2, %v2327_v33  ;;  %v2334_v36 = vadd.f32 %v2310_v25, %v916_v34 }
 0x1b2   : > { %v1776_v37 = vpop.f32.mrf.mxu0 }
 0x1b3   : > { %1873 = vpow2.f32 %v991_v35  ;;  %v989_v38 = vmul.f32 1.442695, %v2334_v36  ;;  %1340 = vst.msk [vmem:[%s2289_s19 + $0x10] sm:$0xff] %vm1337_vm2, %v2334_v36  ;;  %v2341_v39 = vadd.f32 %v1776_v37, %v2310_v25  ;;  %v1180_v37 = vpop.permute.xlu0 %1179 }
 0x1b4   : > { %v926_v40 = vpop.f32.mrf.mxu0 }
 0x1b5   : > { %1875 = vpow2.f32 %v989_v38  ;;  %v995_v41 = vmul.f32 1.442695, %v2341_v39  ;;  %1343 = vst.msk [vmem:[%s2289_s19 + $0x28] sm:$0xff] %vm1337_vm2, %v2341_v39  ;;  %v2348_v42 = vadd.f32 %v2310_v25, %v926_v40 }
 0x1b6   : > { %v1779_v43 = vpop.f32.mrf.mxu0 }
 0x1b7   : > { %1877 = vpow2.f32 %v995_v41  ;;  %v993_v44 = vmul.f32 1.442695, %v2348_v42  ;;  %1342 = vst.msk [vmem:[%s2289_s19 + $0x20] sm:$0xff] %vm1337_vm2, %v2348_v42  ;;  %v2355_v45 = vadd.f32 %v1779_v43, %v2310_v25 }
 0x1b8   : > { %v936_v46 = vpop.f32.mrf.mxu0 }
 0x1b9   : > { %1879 = vpow2.f32 %v993_v44  ;;  %v999_v47 = vmul.f32 1.442695, %v2355_v45  ;;  %1345 = vst.msk [vmem:[%s2289_s19 + $0x38] sm:$0xff] %vm1337_vm2, %v2355_v45  ;;  %v2362_v48 = vadd.f32 %v2310_v25, %v936_v46 }
 0x1ba   : > { %v1782_v49 = vpop.f32.mrf.mxu0 }
 0x1bb   : > { %1881 = vpow2.f32 %v999_v47  ;;  %v997_v50 = vmul.f32 1.442695, %v2362_v48  ;;  %1344 = vst.msk [vmem:[%s2289_s19 + $0x30] sm:$0xff] %vm1337_vm2, %v2362_v48  ;;  %v2369_v51 = vadd.f32 %v1782_v49, %v2310_v25  ;;  %v2492_v47 = vpop.permute.xlu1 %1187 }
 0x1bc   : > { %v1870_v52 = vpop.eup %1869  ;;  %v946_v53 = vpop.f32.mrf.mxu0 }
 0x1bd   : > { %v2371_v54 = vadd.f32 0.0001, %v1870_v52  ;;  %1883 = vpow2.f32 %v997_v50  ;;  %v1003_v55 = vmul.f32 1.442695, %v2369_v51  ;;  %1347 = vst.msk [vmem:[%s2289_s19 + $0x48] sm:$0xff] %vm1337_vm2, %v2369_v51  ;;  %v2378_v56 = vadd.f32 %v2310_v25, %v946_v53 }
 0x1be   : > { %v1872_v57 = vpop.eup %1871  ;;  %v1785_v58 = vpop.f32.mrf.mxu0 }
 0x1bf   : > { %v2380_v59 = vadd.f32 0.0001, %v1872_v57  ;;  %1885 = vpow2.f32 %v1003_v55  ;;  %v1001_v60 = vmul.f32 1.442695, %v2378_v56  ;;  %1346 = vst.msk [vmem:[%s2289_s19 + $0x40] sm:$0xff] %vm1337_vm2, %v2378_v56  ;;  %v2387_v61 = vadd.f32 %v1785_v58, %v2310_v25 }
 0x1c0   : > { %1356 = vst.msk [vmem:[%s2289_s19 + $0x8] sm:$0xff] %vm1354_vm3, %v2371_v54  ;;  %v1874_v62 = vpop.eup %1873  ;;  %v956_v63 = vpop.f32.mrf.mxu0  ;;  %1887 = vrsqrt.f32 %v2371_v54  ;;  %vm1042_vm4 = vcmp.eq.f32.partialorder %v2371_v54, inf  ;;  %vm1044_vm5 = vcmp.eq.f32.partialorder %v2371_v54, 0.0  ;;  %v1045_v32 = vand.u32 2147483648, %v2371_v54 }
 0x1c1   : > { %v2393_v0 = vadd.f32 0.0001, %v1874_v62  ;;  %1889 = vpow2.f32 %v1001_v60  ;;  %v1007_v1 = vmul.f32 1.442695, %v2387_v61  ;;  %1349 = vst.msk [vmem:[%s2289_s19 + $0x58] sm:$0xff] %vm1337_vm2, %v2387_v61  ;;  %v2400_v2 = vadd.f32 %v2310_v25, %v956_v63  ;;  %v2509_v60 = vpop.permute.xlu0 %1185 }
 0x1c2   : > { %1355 = vst.msk [vmem:[%s2289_s19] sm:$0xff] %vm1354_vm3, %v2380_v59  ;;  %v1876_v3 = vpop.eup %1875  ;;  %v1788_v4 = vpop.f32.mrf.mxu1  ;;  %1891 = vrsqrt.f32 %v2380_v59  ;;  %vm1035_vm6 = vcmp.eq.f32.partialorder %v2380_v59, inf  ;;  %vm1037_vm7 = vcmp.eq.f32.partialorder %v2380_v59, 0.0  ;;  %v1038_v40 = vand.u32 2147483648, %v2380_v59 }
 0x1c3   : > { %v2406_v5 = vadd.f32 0.0001, %v1876_v3  ;;  %1893 = vpow2.f32 %v1007_v1  ;;  %v1005_v6 = vmul.f32 1.442695, %v2400_v2  ;;  %1348 = vst.msk [vmem:[%s2289_s19 + $0x50] sm:$0xff] %vm1337_vm2, %v2400_v2  ;;  %v2413_v7 = vadd.f32 %v1788_v4, %v2310_v25 }
 0x1c4   : > { %1358 = vst.msk [vmem:[%s2289_s19 + $0x18] sm:$0xff] %vm1354_vm3, %v2393_v0  ;;  %v1878_v9 = vpop.eup %1877  ;;  %v966_v10 = vpop.f32.mrf.mxu1  ;;  %1895 = vrsqrt.f32 %v2393_v0  ;;  %vm1056_vm8 = vcmp.eq.f32.partialorder %v2393_v0, inf  ;;  %vm1058_vm9 = vcmp.eq.f32.partialorder %v2393_v0, 0.0  ;;  %v1059_v46 = vand.u32 2147483648, %v2393_v0 }
 0x1c5   : > { %v2421_v11 = vadd.f32 0.0001, %v1878_v9  ;;  %1897 = vpow2.f32 %v1005_v6  ;;  %v1011_v13 = vmul.f32 1.442695, %v2413_v7  ;;  %1351 = vst.msk [vmem:[%s2289_s19 + $0x68] sm:$0xff] %vm1337_vm2, %v2413_v7  ;;  %v2428_v14 = vadd.f32 %v2310_v25, %v966_v10 }
 0x1c6   : > { %1357 = vst.msk [vmem:[%s2289_s19 + $0x10] sm:$0xff] %vm1354_vm3, %v2406_v5  ;;  %v1880_v15 = vpop.eup %1879  ;;  %v1791_v16 = vpop.f32.mrf.mxu1  ;;  %1899 = vrsqrt.f32 %v2406_v5  ;;  %vm1049_vm10 = vcmp.eq.f32.partialorder %v2406_v5, inf  ;;  %vm1051_vm11 = vcmp.eq.f32.partialorder %v2406_v5, 0.0  ;;  %v1052_v57 = vand.u32 2147483648, %v2406_v5 }
 0x1c7   : > { %v2434_v17 = vadd.f32 0.0001, %v1880_v15  ;;  %1901 = vpow2.f32 %v1011_v13  ;;  %v1009_v18 = vmul.f32 1.442695, %v2428_v14  ;;  %1350 = vst.msk [vmem:[%s2289_s19 + $0x60] sm:$0xff] %vm1337_vm2, %v2428_v14  ;;  %v2441_v19 = vadd.f32 %v1791_v16, %v2310_v25 }
 0x1c8   : > { %1360 = vst.msk [vmem:[%s2289_s19 + $0x28] sm:$0xff] %vm1354_vm3, %v2421_v11  ;;  %v1882_v21 = vpop.eup %1881  ;;  %v976_v22 = vpop.f32.mrf.mxu1  ;;  %1903 = vrsqrt.f32 %v2421_v11  ;;  %vm1070_vm12 = vcmp.eq.f32.partialorder %v2421_v11, inf  ;;  %vm1072_vm13 = vcmp.eq.f32.partialorder %v2421_v11, 0.0  ;;  %v1073_v15 = vand.u32 2147483648, %v2421_v11 }
 0x1c9   : > { %v2449_v23 = vadd.f32 0.0001, %v1882_v21  ;;  %1905 = vpow2.f32 %v1009_v18  ;;  %v1015_v24 = vmul.f32 1.442695, %v2441_v19  ;;  %1353 = vst.msk [vmem:[%s2289_s19 + $0x78] sm:$0xff] %vm1337_vm2, %v2441_v19  ;;  %v2456_v12 = vadd.f32 %v2310_v25, %v976_v22 }
 0x1ca   : > { %1359 = vst.msk [vmem:[%s2289_s19 + $0x20] sm:$0xff] %vm1354_vm3, %v2434_v17  ;;  %v1884_v28 = vpop.eup %1883  ;;  %1907 = vrsqrt.f32 %v2434_v17  ;;  %vm1063_vm14 = vcmp.eq.f32.partialorder %v2434_v17, inf  ;;  %vm1065_vm15 = vcmp.eq.f32.partialorder %v2434_v17, 0.0 }
 0x1cb   : > { %v2464_v29 = vadd.f32 0.0001, %v1884_v28  ;;  %1909 = vpow2.f32 %v1015_v24  ;;  %v1013_v31 = vmul.f32 1.442695, %v2456_v12  ;;  %1352 = vst.msk [vmem:[%s2289_s19 + $0x70] sm:$0xff] %vm1337_vm2, %v2456_v12  ;;  %vm1084_vm0 = vcmp.eq.f32.partialorder %v2449_v23, inf }
 0x1cc   : > { %1362 = vst.msk [vmem:[%s2289_s19 + $0x38] sm:$0xff] %vm1354_vm3, %v2449_v23  ;;  %v1886_v25 = vpop.eup %1885  ;;  %1911 = vrsqrt.f32 %v2449_v23  ;;  %vm1086_vm1 = vcmp.eq.f32.partialorder %v2449_v23, 0.0 }
 0x1cd   : > { %v1888_v34 = vpop.eup %1887  ;;  %v2477_v35 = vadd.f32 0.0001, %v1886_v25  ;;  %1913 = vpow2.f32 %v1013_v31  ;;  %1361 = vst.msk [vmem:[%s2289_s19 + $0x30] sm:$0xff] %vm1354_vm3, %v2464_v29  ;;  %vm1077_vm2 = vcmp.eq.f32.partialorder %v2464_v29, inf }
 0x1ce   : > { %v1890_v38 = vpop.eup %1889  ;;  %v1041_v41 = vmul.f32 %v1888_v34, %v2371_v54  ;;  %1915 = vrsqrt.f32 %v2464_v29  ;;  %v1066_v34 = vand.u32 2147483648, %v2434_v17 }
 0x1cf   : > { %v1892_v43 = vpop.eup %1891  ;;  %v2488_v44 = vadd.f32 0.0001, %v1890_v38  ;;  %1917 = vrsqrt.f32 %v2477_v35  ;;  %1364 = vst.msk [vmem:[%s2289_s19 + $0x48] sm:$0xff] %vm1354_vm3, %v2477_v35 }
 0x1d0   : > { %v1894_v49 = vpop.eup %1893  ;;  %v1034_v50 = vmul.f32 %v1892_v43, %v2380_v59  ;;  %v1043_v52 = vsel %vm1042_vm4, %v2371_v54, %v1041_v41  ;;  %vm1079_vm4 = vcmp.eq.f32.partialorder %v2464_v29, 0.0 }
 0x1d1   : > { %v1896_v53 = vpop.eup %1895  ;;  %v2504_v55 = vadd.f32 0.0001, %v1894_v49  ;;  %v1046_v58 = vsel %vm1044_vm5, %v1045_v32, %v1043_v52  ;;  %1919 = vrsqrt.f32 %v2488_v44  ;;  %1363 = vst.msk [vmem:[%s2289_s19 + $0x40] sm:$0xff] %vm1354_vm3, %v2488_v44  ;;  %v1087_v49 = vand.u32 2147483648, %v2449_v23 }
 0x1d2   : > { %v1898_v62 = vpop.eup %1897  ;;  %v1036_v63 = vsel %vm1035_vm6, %v2380_v59, %v1034_v50  ;;  %v1226_v1 = vmul.f32 %v1180_v37, %v1046_v58  ;;  %v1055_v3 = vmul.f32 %v1896_v53, %v2393_v0  ;;  %v1190_v37 = vpop.permute.xlu0 %1189  ;;  %vm1098_vm5 = vcmp.eq.f32.partialorder %v2477_v35, inf }
 0x1d3   : > { %v1900_v4 = vpop.eup %1899  ;;  %v2520_v54 = vadd.f32 0.0001, %v1898_v62  ;;  %v1039_v6 = vsel %vm1037_vm7, %v1038_v40, %v1036_v63  ;;  %1921 = vrsqrt.f32 %v2504_v55  ;;  %1366 = vst.msk [vmem:[%s2289_s19 + $0x58] sm:$0xff] %vm1354_vm3, %v2504_v55  ;;  %vm1100_vm6 = vcmp.eq.f32.partialorder %v2477_v35, 0.0 }
 0x1d4   : > { %v1902_v9 = vpop.eup %1901  ;;  %v1225_v10 = vmul.f32 %v2443_v20, %v1039_v6  ;;  %v1048_v13 = vmul.f32 %v1900_v4, %v2406_v5  ;;  %1259 = vrot.lane.b32.xlu1 %v1226_v1, %s1997_s23  ;;  %v1057_v59 = vsel %vm1056_vm8, %v2393_v0, %v1055_v3  ;;  %v1192_v20 = vpop.permute.xlu1 %1191  ;;  %v1080_v3 = vand.u32 2147483648, %v2464_v29 }
 0x1d5   : > { %v1904_v16 = vpop.eup %1903  ;;  %v2536_v18 = vadd.f32 0.0001, %v1902_v9  ;;  %v1060_v21 = vsel %vm1058_vm9, %v1059_v46, %v1057_v59  ;;  %1365 = vst.msk [vmem:[%s2289_s19 + $0x50] sm:$0xff] %vm1354_vm3, %v2520_v54  ;;  %1923 = vrsqrt.f32 %v2520_v54  ;;  %vm1093_vm7 = vcmp.eq.f32.partialorder %v2488_v44, 0.0 }
 0x1d6   : > { %v1906_v22 = vpop.eup %1905  ;;  %v1050_v24 = vsel %vm1049_vm10, %v2406_v5, %v1048_v13  ;;  %v1228_v28 = vmul.f32 %v2458_v26, %v1060_v21  ;;  %1257 = vrot.lane.b32.xlu0 %v1225_v10, %s1997_s23  ;;  %v1069_v0 = vmul.f32 %v1904_v16, %v2421_v11  ;;  %vm1112_vm8 = vcmp.eq.f32.partialorder %v2504_v55, inf }
 0x1d7   : > { %v1908_v31 = vpop.eup %1907  ;;  %v2552_v25 = vadd.f32 0.0001, %v1906_v22  ;;  %v1053_v32 = vsel %vm1051_vm11, %v1052_v57, %v1050_v24  ;;  %1368 = vst.msk [vmem:[%s2289_s19 + $0x68] sm:$0xff] %vm1354_vm3, %v2536_v18  ;;  %1925 = vrsqrt.f32 %v2536_v18  ;;  %v1094_v24 = vand.u32 2147483648, %v2488_v44 }
 0x1d8   : > { %v1910_v26 = vpop.eup %1909  ;;  %v1227_v38 = vmul.f32 %v2415_v8, %v1053_v32  ;;  %1263 = vrot.lane.b32.xlu1 %v1228_v28, %s1997_s23  ;;  %v1071_v40 = vsel %vm1070_vm12, %v2421_v11, %v1069_v0  ;;  %v1062_v5 = vmul.f32 %v1908_v31, %v2434_v17  ;;  %vm1114_vm9 = vcmp.eq.f32.partialorder %v2504_v55, 0.0 }
 0x1d9   : > { %v1912_v41 = vpop.eup %1911  ;;  %v2568_v43 = vadd.f32 0.0001, %v1910_v26  ;;  %v1074_v46 = vsel %vm1072_vm13, %v1073_v15, %v1071_v40  ;;  %1367 = vst.msk [vmem:[%s2289_s19 + $0x60] sm:$0xff] %vm1354_vm3, %v2552_v25  ;;  %1927 = vrsqrt.f32 %v2552_v25  ;;  %vm1105_vm10 = vcmp.eq.f32.partialorder %v2520_v54, inf }
 0x1da   : > { %v1914_v8 = vpop.eup %1913  ;;  %v1230_v50 = vmul.f32 %v2492_v47, %v1074_v46  ;;  %1261 = vrot.lane.b32.xlu0 %v1227_v38, %s1997_s23  ;;  %v1064_v52 = vsel %vm1063_vm14, %v2434_v17, %v1062_v5  ;;  %v1083_v11 = vmul.f32 %v1912_v41, %v2449_v23  ;;  %v1196_v47 = vpop.permute.xlu1 %1195  ;;  %v1108_v41 = vand.u32 2147483648, %v2520_v54 }
 0x1db   : > { %v1916_v53 = vpop.eup %1915  ;;  %v2584_v57 = vadd.f32 0.0001, %v1914_v8  ;;  %v1067_v58 = vsel %vm1065_vm15, %v1066_v34, %v1064_v52  ;;  %1370 = vst.msk [vmem:[%s2289_s19 + $0x78] sm:$0xff] %vm1354_vm3, %v2568_v43  ;;  %1929 = vrsqrt.f32 %v2568_v43  ;;  %vm1107_vm11 = vcmp.eq.f32.partialorder %v2520_v54, 0.0 }
 0x1dc   : > { %v1918_v62 = vpop.eup %1917  ;;  %v1229_v63 = vmul.f32 %v2509_v60, %v1067_v58  ;;  %1267 = vrot.lane.b32.xlu1 %v1230_v50, %s1997_s23  ;;  %v1085_v1 = vsel %vm1084_vm0, %v2449_v23, %v1083_v11  ;;  %v1076_v17 = vmul.f32 %v1916_v53, %v2464_v29  ;;  %v1194_v60 = vpop.permute.xlu0 %1193  ;;  %v1101_v23 = vand.u32 2147483648, %v2477_v35 }
 0x1dd   : > { %v1088_v4 = vsel %vm1086_vm1, %v1087_v49, %v1085_v1  ;;  %v1097_v6 = vmul.f32 %v1918_v62, %v2477_v35  ;;  %1369 = vst.msk [vmem:[%s2289_s19 + $0x70] sm:$0xff] %vm1354_vm3, %v2584_v57  ;;  %vm1091_vm3 = vcmp.eq.f32.partialorder %v2488_v44, inf  ;;  %1931 = vrsqrt.f32 %v2584_v57 }
 0x1de   : > { %v1920_v9 = vpop.eup %1919  ;;  %v1232_v10 = vmul.f32 %v1192_v20, %v1088_v4  ;;  %1265 = vrot.lane.b32.xlu0 %v1229_v63, %s1997_s23  ;;  %v1078_v13 = vsel %vm1077_vm2, %v2464_v29, %v1076_v17  ;;  %v1200_v0 = vpop.permute.xlu1 %1199  ;;  %vm1126_vm12 = vcmp.eq.f32.partialorder %v2536_v18, inf  ;;  %v1129_v53 = vand.u32 2147483648, %v2536_v18 }
 0x1df   : > { %v1081_v59 = vsel %vm1079_vm4, %v1080_v3, %v1078_v13  ;;  %v1099_v15 = vsel %vm1098_vm5, %v2477_v35, %v1097_v6  ;;  %v1090_v16 = vmul.f32 %v1920_v9, %v2488_v44  ;;  %v1115_v35 = vand.u32 2147483648, %v2504_v55 }
 0x1e0   : > { %v1922_v21 = vpop.eup %1921  ;;  %v1231_v20 = vmul.f32 %v1190_v37, %v1081_v59  ;;  %1271 = vrot.lane.b32.xlu1 %v1232_v10, %s1997_s23  ;;  %v1102_v22 = vsel %vm1100_vm6, %v1101_v23, %v1099_v15  ;;  %v1198_v38 = vpop.permute.xlu0 %1197  ;;  %vm1128_vm13 = vcmp.eq.f32.partialorder %v2536_v18, 0.0  ;;  %vm1119_vm14 = vcmp.eq.f32.partialorder %v2552_v25, inf }
 0x1e1   : > { %v1234_v28 = vmul.f32 %v1196_v47, %v1102_v22  ;;  %v1092_v29 = vsel %vm1091_vm3, %v2488_v44, %v1090_v16  ;;  %v1111_v31 = vmul.f32 %v1922_v21, %v2504_v55  ;;  %v1122_v63 = vand.u32 2147483648, %v2552_v25 }
 0x1e2   : > { %1269 = vrot.lane.b32.xlu0 %v1231_v20, %s1997_s23  ;;  %v1095_v32 = vsel %vm1093_vm7, %v1094_v24, %v1092_v29  ;;  %v1924_v34 = vpop.eup %1923  ;;  %vm1121_vm15 = vcmp.eq.f32.partialorder %v2552_v25, 0.0  ;;  %vm1140_vm0 = vcmp.eq.f32.partialorder %v2568_v43, inf  ;;  %v1143_v10 = vand.u32 2147483648, %v2568_v43 }
 0x1e3   : > { %v1233_v37 = vmul.f32 %v1194_v60, %v1095_v32  ;;  %v1113_v26 = vsel %vm1112_vm8, %v2504_v55, %v1111_v31  ;;  %v1104_v40 = vmul.f32 %v1924_v34, %v2520_v54  ;;  %v1204_v55 = vpop.permute.xlu1 %1203  ;;  %vm1142_vm1 = vcmp.eq.f32.partialorder %v2568_v43, 0.0 }
 0x1e4   : > { %1275 = vrot.lane.b32.xlu1 %v1234_v28, %s1997_s23  ;;  %v1116_v44 = vsel %vm1114_vm9, %v1115_v35, %v1113_v26  ;;  %v1926_v46 = vpop.eup %1925  ;;  %v1202_v47 = vpop.permute.xlu0 %1201  ;;  %vm1133_vm2 = vcmp.eq.f32.partialorder %v2584_v57, inf  ;;  %v1136_v15 = vand.u32 2147483648, %v2584_v57  ;;  %vm1135_vm4 = vcmp.eq.f32.partialorder %v2584_v57, 0.0 }
 0x1e5   : > { %v1236_v5 = vmul.f32 %v1200_v0, %v1116_v44  ;;  %v1106_v49 = vsel %vm1105_vm10, %v2520_v54, %v1104_v40  ;;  %v1125_v50 = vmul.f32 %v1926_v46, %v2536_v18  ;;  %vm1435_vm5 = vcmask 392448  }
 0x1e6   : > { %1273 = vrot.lane.b32.xlu0 %v1233_v37, %s1997_s23  ;;  %v1109_v8 = vsel %vm1107_vm11, %v1108_v41, %v1106_v49  ;;  %v1928_v52 = vpop.eup %1927 }
 0x1e7   : > { %v1235_v11 = vmul.f32 %v1198_v38, %v1109_v8  ;;  %v1127_v58 = vsel %vm1126_vm12, %v2536_v18, %v1125_v50  ;;  %v1118_v62 = vmul.f32 %v1928_v52, %v2552_v25  ;;  %v1208_v9 = vpop.permute.xlu1 %1207 }
 0x1e8   : > { %1279 = vrot.lane.b32.xlu1 %v1236_v5, %s1997_s23  ;;  %v1130_v54 = vsel %vm1128_vm13, %v1129_v53, %v1127_v58  ;;  %v1930_v1 = vpop.eup %1929 }
 0x1e9   : > { %v1238_v17 = vmul.f32 %v1204_v55, %v1130_v54  ;;  %v1120_v3 = vsel %vm1119_vm14, %v2552_v25, %v1118_v62  ;;  %v1139_v6 = vmul.f32 %v1930_v1, %v2568_v43  ;;  %v1206_v25 = vpop.permute.xlu0 %1205 }
 0x1ea   : > { %1277 = vrot.lane.b32.xlu0 %v1235_v11, %s1997_s23  ;;  %v1123_v4 = vsel %vm1121_vm15, %v1122_v63, %v1120_v3  ;;  %v1932_v18 = vpop.eup %1931 }
 0x1eb   : > { %v1237_v60 = vmul.f32 %v1202_v47, %v1123_v4  ;;  %v1141_v13 = vsel %vm1140_vm0, %v2568_v43, %v1139_v6  ;;  %v1132_v23 = vmul.f32 %v1932_v18, %v2584_v57 }
 0x1ec   : > { %1283 = vrot.lane.b32.xlu1 %v1238_v17, %s1997_s23  ;;  %v1144_v59 = vsel %vm1142_vm1, %v1143_v10, %v1141_v13 }
 0x1ed   : > { %v1240_v16 = vmul.f32 %v1208_v9, %v1144_v59  ;;  %v1134_v21 = vsel %vm1133_vm2, %v2584_v57, %v1132_v23 }
 0x1ee   : > { %1281 = vrot.lane.b32.xlu0 %v1237_v60, %s1997_s23  ;;  %v1137_v20 = vsel %vm1135_vm4, %v1136_v15, %v1134_v21 }
 0x1ef   : > { %v1239_v22 = vmul.f32 %v1206_v25, %v1137_v20 }
 0x1f0   : > { %1287 = vrot.lane.b32.xlu1 %v1240_v16, %s1997_s23 }
 0x1f2   : > { %1285 = vrot.lane.b32.xlu0 %v1239_v22, %s1997_s23 }
 0x246   : > { %v1260_v43 = vpop.permute.xlu1 %1259 }
 0x247   : > { %v1306_v24 = vadd.f32 %v1260_v43, %v2313_v27 }
 0x248   : > { %v1258_v28 = vpop.permute.xlu0 %1257 }
 0x249   : > { %v1305_v29 = vadd.f32 %v1258_v28, %v2320_v30  ;;  %1389 = vrot.lane.b32.xlu1 %v1306_v24, %s1998_s24 }
 0x24a   : > { %v1264_v0 = vpop.permute.xlu1 %1263 }
 0x24b   : > { %v1308_v31 = vadd.f32 %v1264_v0, %v2327_v33  ;;  %1387 = vrot.lane.b32.xlu0 %v1305_v29, %s1998_s24 }
 0x24c   : > { %v1262_v57 = vpop.permute.xlu0 %1261 }
 0x24d   : > { %v1307_v32 = vadd.f32 %v1262_v57, %v2334_v36  ;;  %1393 = vrot.lane.b32.xlu1 %v1308_v31, %s1998_s24 }
 0x24e   : > { %v1268_v35 = vpop.permute.xlu1 %1267 }
 0x24f   : > { %v1310_v34 = vadd.f32 %v1268_v35, %v2341_v39  ;;  %1391 = vrot.lane.b32.xlu0 %v1307_v32, %s1998_s24 }
 0x250   : > { %v1266_v27 = vpop.permute.xlu0 %1265 }
 0x251   : > { %v1309_v30 = vadd.f32 %v1266_v27, %v2348_v42  ;;  %1397 = vrot.lane.b32.xlu1 %v1310_v34, %s1998_s24 }
 0x252   : > { %v1272_v37 = vpop.permute.xlu1 %1271 }
 0x253   : > { %v1312_v33 = vadd.f32 %v1272_v37, %v2355_v45  ;;  %1395 = vrot.lane.b32.xlu0 %v1309_v30, %s1998_s24 }
 0x254   : > { %v1270_v26 = vpop.permute.xlu0 %1269 }
 0x255   : > { %v1311_v36 = vadd.f32 %v1270_v26, %v2362_v48  ;;  %1401 = vrot.lane.b32.xlu1 %v1312_v33, %s1998_s24 }
 0x256   : > { %v1276_v38 = vpop.permute.xlu1 %1275 }
 0x257   : > { %v1314_v39 = vadd.f32 %v1276_v38, %v2369_v51  ;;  %1399 = vrot.lane.b32.xlu0 %v1311_v36, %s1998_s24 }
 0x258   : > { %v1274_v44 = vpop.permute.xlu0 %1273 }
 0x259   : > { %v1313_v42 = vadd.f32 %v1274_v44, %v2378_v56  ;;  %1405 = vrot.lane.b32.xlu1 %v1314_v39, %s1998_s24 }
 0x25a   : > { %v1280_v40 = vpop.permute.xlu1 %1279 }
 0x25b   : > { %v1316_v45 = vadd.f32 %v1280_v40, %v2387_v61  ;;  %1403 = vrot.lane.b32.xlu0 %v1313_v42, %s1998_s24 }
 0x25c   : > { %v1278_v5 = vpop.permute.xlu0 %1277 }
 0x25d   : > { %v1315_v48 = vadd.f32 %v1278_v5, %v2400_v2  ;;  %1409 = vrot.lane.b32.xlu1 %v1316_v45, %s1998_s24 }
 0x25e   : > { %v1284_v41 = vpop.permute.xlu1 %1283 }
 0x25f   : > { %1407 = vrot.lane.b32.xlu0 %v1315_v48, %s1998_s24  ;;  %v1318_v51 = vadd.f32 %v1284_v41, %v2413_v7 }
 0x260   : > { %v1282_v56 = vpop.permute.xlu0 %1281 }
 0x261   : > { %v1317_v46 = vadd.f32 %v1282_v56, %v2428_v14  ;;  %1413 = vrot.lane.b32.xlu1 %v1318_v51, %s1998_s24 }
 0x262   : > { %v1288_v61 = vpop.permute.xlu1 %1287 }
 0x263   : > { %1411 = vrot.lane.b32.xlu0 %v1317_v46, %s1998_s24  ;;  %v1320_v2 = vadd.f32 %v1288_v61, %v2441_v19 }
 0x264   : > { %v1286_v49 = vpop.permute.xlu0 %1285 }
 0x265   : > { %v1319_v8 = vadd.f32 %v1286_v49, %v2456_v12  ;;  %1417 = vrot.lane.b32.xlu1 %v1320_v2, %s1998_s24 }
 0x267   : > { %1415 = vrot.lane.b32.xlu0 %v1319_v8, %s1998_s24 }
 0x2bb   : > { %v1390_v7 = vpop.permute.xlu1 %1389 }
 0x2bc   : > { %1437 = vst.msk [vmem:[%s2289_s19 + $0x8] sm:$0xff] %vm1435_vm5, %v1390_v7 }
 0x2bd   : > { %v1388_v14 = vpop.permute.xlu0 %1387 }
 0x2be   : > { %1436 = vst.msk [vmem:[%s2289_s19] sm:$0xff] %vm1435_vm5, %v1388_v14 }
 0x2bf   : > { %v1394_v19 = vpop.permute.xlu1 %1393 }
 0x2c0   : > { %1439 = vst.msk [vmem:[%s2289_s19 + $0x18] sm:$0xff] %vm1435_vm5, %v1394_v19 }
 0x2c1   : > { %v1392_v12 = vpop.permute.xlu0 %1391 }
 0x2c2   : > { %1438 = vst.msk [vmem:[%s2289_s19 + $0x10] sm:$0xff] %vm1435_vm5, %v1392_v12 }
 0x2c3   : > { %v1398_v55 = vpop.permute.xlu1 %1397 }
 0x2c4   : > { %1441 = vst.msk [vmem:[%s2289_s19 + $0x28] sm:$0xff] %vm1435_vm5, %v1398_v55 }
 0x2c5   : > { %v1396_v50 = vpop.permute.xlu0 %1395 }
 0x2c6   : > { %1440 = vst.msk [vmem:[%s2289_s19 + $0x20] sm:$0xff] %vm1435_vm5, %v1396_v50 }
 0x2c7   : > { %v1402_v52 = vpop.permute.xlu1 %1401 }
 0x2c8   : > { %1443 = vst.msk [vmem:[%s2289_s19 + $0x38] sm:$0xff] %vm1435_vm5, %v1402_v52 }
 0x2c9   : > { %v1400_v11 = vpop.permute.xlu0 %1399 }
 0x2ca   : > { %1442 = vst.msk [vmem:[%s2289_s19 + $0x30] sm:$0xff] %vm1435_vm5, %v1400_v11 }
 0x2cb   : > { %v1406_v53 = vpop.permute.xlu1 %1405 }
 0x2cc   : > { %1445 = vst.msk [vmem:[%s2289_s19 + $0x48] sm:$0xff] %vm1435_vm5, %v1406_v53 }
 0x2cd   : > { %v1404_v58 = vpop.permute.xlu0 %1403 }
 0x2ce   : > { %1444 = vst.msk [vmem:[%s2289_s19 + $0x40] sm:$0xff] %vm1435_vm5, %v1404_v58 }
 0x2cf   : > { %v1410_v47 = vpop.permute.xlu1 %1409 }
 0x2d0   : > { %1447 = vst.msk [vmem:[%s2289_s19 + $0x58] sm:$0xff] %vm1435_vm5, %v1410_v47 }
 0x2d1   : > { %v1408_v62 = vpop.permute.xlu0 %1407 }
 0x2d2   : > { %1446 = vst.msk [vmem:[%s2289_s19 + $0x50] sm:$0xff] %vm1435_vm5, %v1408_v62 }
 0x2d3   : > { %v1414_v54 = vpop.permute.xlu1 %1413 }
 0x2d4   : > { %1449 = vst.msk [vmem:[%s2289_s19 + $0x68] sm:$0xff] %vm1435_vm5, %v1414_v54 }
 0x2d5   : > { %v1412_v63 = vpop.permute.xlu0 %1411 }
 0x2d6   : > { %1448 = vst.msk [vmem:[%s2289_s19 + $0x60] sm:$0xff] %vm1435_vm5, %v1412_v63 }
 0x2d7   : > { %v1418_v1 = vpop.permute.xlu1 %1417 }
 0x2d8   : > { %1451 = vst.msk [vmem:[%s2289_s19 + $0x78] sm:$0xff] %vm1435_vm5, %v1418_v1 }
 0x2d9   : > { %v1416_v17 = vpop.permute.xlu0 %1415 }
 0x2da   : > { %1450 = vst.msk [vmem:[%s2289_s19 + $0x70] sm:$0xff] %vm1435_vm5, %v1416_v17 }
 0x2db   : > { %1946 = shalt.err (!%p1943_p3)
}
 0x2dc   : > { %s1947_s13 = scalar_lea.hbm %s2730_s17, 2048  ;;  %s1951_s24 = scalar_lea.hbm %s2788_s8, 4096 }
 0x2dd   : > { %p1948_p4 = scmp.ne.s32.totalorder %s2730_s17, %s1947_s13  ;;  %p1952_p9 = scmp.lt.s32.totalorder %s2730_s17, %s2788_s8 }
 0x2de   : > { %p1953_p10 = scmp.lt.s32.totalorder %s1951_s24, %s1947_s13 }
 0x2df   : > { %p1949_p7 = pnand %p1948_p4, %p2085_p5 }
 0x2e0   : > { %p1954_p11 = por %p1953_p10, %p1952_p9 }
 0x2e1   : > { %p1950_p8 = pneg %p1949_p7 }
 0x2e3   : > { %p1955_p12 = pnand %p1954_p11, %p1950_p8 }
 0x2e5   : > { %1958 = shalt.err (!%p1955_p12)
}
 0x2e6   : > { %s2000_s10 = smov 128   ;;  %s2001_s12 = smov 8  }
 0x2e7   : > { %1824 = dma.vmem_to_hbm [thread:$0]  (%p2085_p5), %s2732_s26, 2048, %s2730_s17, %s2740_s9, %s2000_s10, %s2000_s10, %s2001_s12  }
 0x2e8 PF: > { %p1830_p13 = scmp.ge.s32.totalorder %s1993_s30, 2  ;;  %s1481_s18 = sand.u32 1, %s1981_s27  }
 0x2e9   : > { %s1482_s20 = scalar_lea.sflag [#allocation3], %s1481_s18 }
 0x2ea   : > { %p1827_p0 = pnand %p1830_p13, %p2089_p6 }
 0x2ec   : > { %p1828_p1 = pneg %p1827_p0 }
 0x2ee   : > { %1976 = dma.done.wait (%p1828_p1), %s1482_s20, 2048  }
 0x2ef   : > { %1978 = vsyncadd (%p1828_p1), %s1482_s20, 4294965248  ;;  %p18_p2 = scmp.ge.s32.totalorder %s2072_s11, 4   ;;  %s2791_s27 = smov %s1985_s28 }
 0x2f0   : > { %s2792_s28 = smov %s1989_s29  ;;  %s2793_s29 = smov %s2083_s14 }
 0x2f1   : > { %s2794_s30 = smov %s2072_s11  ;;  %20 = sbr.rel (!%p18_p2) target bundleno = 3 (0x3), region = 93 }
 0x2f6   :  { %1487 = vsyncpa [#allocation3], 1 }
 0x2f7   :  { %1489 = vsyncpa [#allocation3 + $0x1], 1 }

</bundles_post_ra>
